<compile_context>
chip_gen: v5e
topology: v5e:2x2
jax: 0.10.0
libtpu: 0.0.40
codegen_flags: <defaults>
</compile_context>

<pallas_src>
import functools
import math

import jax
import jax.numpy as jnp
from jax.experimental import pallas as pl
from jax.experimental.pallas import tpu as pltpu

LANE = 128


def _round_up(x, m):
    return ((x + m - 1) // m) * m


def _lcm(a, b):
    return a * b // math.gcd(a, b)


def _vmem_limit_bytes():
    """Per-generation scoped-VMEM budget (~48 MiB on v7x, ~96 MiB on v5e/v6e)."""
    try:
        cap = int(pltpu.get_tpu_info().vmem_capacity_bytes)
    except Exception:  # interpret mode / older runtimes
        cap = 128 * 1024 * 1024
    return int(min(cap * 3 // 4, 96 * 1024 * 1024))


def _plan_tiles(n, heads, *, tm_req=1024, tk_req=4096):
    """Pick (tm, tk, n_pad) for the (n_pad, n_pad) propagation matmuls.

    tm: row tile (parallel axis), multiple of 8 sublanes and of `heads`.
    tk: contraction tile, multiple of 128 lanes.
    n_pad: padded vertex count, a multiple of both tm and tk; padding waste is
    bounded (granularity <= max(128, ~n/8) capped at tk_req).
    """
    align_m = _lcm(8, heads)
    # power-of-two padding granularity, capped so padding waste stays small
    p = 128
    while p * 2 <= min(tk_req, max(128, n // 8)):
        p *= 2
    gran = _lcm(p, align_m)
    n_pad = _round_up(max(n, align_m), gran)

    tk = min(tk_req, n_pad)
    while n_pad % tk:
        tk -= LANE            # fall back to a 128-multiple divisor of n_pad

    tm = min(tm_req, n_pad)
    tm -= tm % align_m
    while n_pad % tm:
        tm -= align_m

    # v7x has 2 TensorCores sharded over the parallel row axis: prefer >= 2 tiles.
    if n_pad // tm < 2:
        half = n_pad // 2
        if half >= align_m and half % align_m == 0:
            tm = half
    return tm, tk, n_pad


# ---------------------------------------------------------------------------
# Kernel 1: theta_1 — row-tiled dense linear:  xw1 = x @ W1 + b1 (lane-padded)
# ---------------------------------------------------------------------------
def _linear_kernel(x_ref, w_ref, b_ref, o_ref):
    xw = jnp.dot(x_ref[...], w_ref[...], preferred_element_type=jnp.float32)
    o_ref[...] = (xw + b_ref[...]).astype(o_ref.dtype)


def linear(x, w, b, *, tm, out_dtype):
    n, in_ft = x.shape
    out_ft = w.shape[1]
    cost = pl.CostEstimate(
        flops=2 * n * in_ft * out_ft,
        transcendentals=0,
        bytes_accessed=int(x.dtype.itemsize * n * in_ft
                           + w.dtype.itemsize * in_ft * out_ft
                           + b.dtype.itemsize * out_ft
                           + jnp.dtype(out_dtype).itemsize * n * out_ft),
    )
    return pl.pallas_call(
        _linear_kernel,
        out_shape=jax.ShapeDtypeStruct((n, out_ft), out_dtype),
        grid_spec=pltpu.PrefetchScalarGridSpec(
            num_scalar_prefetch=0,
            grid=(n // tm,),
            in_specs=[
                pl.BlockSpec((tm, in_ft), lambda i: (i, 0)),
                pl.BlockSpec((in_ft, out_ft), lambda i: (0, 0)),
                pl.BlockSpec((1, out_ft), lambda i: (0, 0)),
            ],
            out_specs=pl.BlockSpec((tm, out_ft), lambda i: (i, 0)),
        ),
        compiler_params=pltpu.CompilerParams(
            dimension_semantics=("parallel",),
            vmem_limit_bytes=_vmem_limit_bytes(),
        ),
        cost_estimate=cost,
    )(x, w, b)


# ---------------------------------------------------------------------------
# Kernel 2 (fused layer 1): h = relu(G @ xw1), then in the finalize branch
#   - per-row-tile structure-KL partial sum
#   - xw2 = h @ W2 + b2  (second-layer theta projection)
# h never leaves VMEM.
# ---------------------------------------------------------------------------
def _prop1_fused_kernel(g_ref, xw1_ref, att_ref, w2_ref, b2_ref,
                        xw2_ref, kl_ref, acc_ref, *, inv_c):
    k = pl.program_id(1)

    @pl.when(k == 0)
    def _():
        acc_ref[...] = jnp.zeros_like(acc_ref)

    acc_ref[...] += jnp.dot(g_ref[...], xw1_ref[...],
                            preferred_element_type=jnp.float32)

    @pl.when(k == pl.num_programs(1) - 1)
    def _():
        h = jnp.maximum(acc_ref[...], 0.0)                        # relu, (tm, Hp) f32

        # ---- structure-KL epilogue (rides in DMA/MXU slack of the main loop) ----
        # alpha_r = clamp(sigmoid(leaky_relu(mean_c h[r,c]*att[r%heads,c], 0.2)), .01, .99)
        s = jnp.sum(h * att_ref[...], axis=-1, keepdims=True) * inv_c
        a = jnp.where(s >= 0.0, s, 0.2 * s)                       # leaky_relu(0.2)
        a = jnp.clip(jax.nn.sigmoid(a), 0.01, 0.99)
        kl = a * jnp.log(2.0 * a) + (1.0 - a) * jnp.log(2.0 * (1.0 - a))
        kl_sum = jnp.sum(kl)              # zero-padded rows contribute exactly 0
        row = jax.lax.broadcasted_iota(jnp.int32, kl_ref.shape, 0)
        lane = jax.lax.broadcasted_iota(jnp.int32, kl_ref.shape, 1)
        kl_ref[...] = jnp.where((row == 0) & (lane == 0), kl_sum, 0.0)

        # ---- second-layer theta projection: xw2 = h @ W2 + b2 ----
        xw2 = jnp.dot(h, w2_ref[...], preferred_element_type=jnp.float32)
        xw2_ref[...] = (xw2 + b2_ref[...]).astype(xw2_ref.dtype)


def propagate1_fused(g, xw1, att_tile, w2, b2, n_hid, *, tm, tk, xw2_dtype):
    n_pad = g.shape[0]
    h_p = xw1.shape[1]
    c_p = w2.shape[1]
    n_row = n_pad // tm
    n_k = n_pad // tk
    cost = pl.CostEstimate(
        flops=2 * n_pad * n_pad * h_p + 2 * n_pad * h_p * c_p,
        transcendentals=3 * n_pad,
        bytes_accessed=int(g.dtype.itemsize * n_pad * n_pad
                           + xw1.dtype.itemsize * n_pad * h_p * n_row
                           + jnp.dtype(xw2_dtype).itemsize * n_pad * c_p),
    )
    kernel = functools.partial(_prop1_fused_kernel, inv_c=1.0 / float(n_hid))
    return pl.pallas_call(
        kernel,
        out_shape=(
            jax.ShapeDtypeStruct((n_pad, c_p), xw2_dtype),        # xw2 = h@W2 + b2
            jax.ShapeDtypeStruct((n_row * 8, LANE), jnp.float32), # per-tile KL sums
        ),
        grid_spec=pltpu.PrefetchScalarGridSpec(
            num_scalar_prefetch=0,
            grid=(n_row, n_k),
            in_specs=[
                pl.BlockSpec((tm, tk), lambda i, k: (i, k)),      # G tile
                pl.BlockSpec((tk, h_p), lambda i, k: (k, 0)),     # xw1 tile
                pl.BlockSpec((tm, h_p), lambda i, k: (0, 0)),     # att (one row tile)
                pl.BlockSpec((h_p, c_p), lambda i, k: (0, 0)),    # W2 (resident)
                pl.BlockSpec((1, c_p), lambda i, k: (0, 0)),      # b2 (resident)
            ],
            out_specs=[
                pl.BlockSpec((tm, c_p), lambda i, k: (i, 0)),
                pl.BlockSpec((8, LANE), lambda i, k: (i, 0)),
            ],
            scratch_shapes=[pltpu.VMEM((tm, h_p), jnp.float32)],
        ),
        compiler_params=pltpu.CompilerParams(
            dimension_semantics=("parallel", "arbitrary"),
            vmem_limit_bytes=_vmem_limit_bytes(),
        ),
        cost_estimate=cost,
    )(g, xw1, att_tile, w2, b2)


# ---------------------------------------------------------------------------
# Kernel 3: y1 = G @ xw2 — f32 output block stays VMEM-resident across the k
# axis, so it doubles as the accumulator (no scratch needed).
# ---------------------------------------------------------------------------
def _propagate_kernel(g_ref, xw_ref, o_ref):
    @pl.when(pl.program_id(1) == 0)
    def _():
        o_ref[...] = jnp.zeros_like(o_ref)

    o_ref[...] += jnp.dot(g_ref[...], xw_ref[...],
                          preferred_element_type=jnp.float32)


def propagate(g, xw, *, tm, tk):
    n_pad = g.shape[0]
    feat = xw.shape[1]
    n_row = n_pad // tm
    cost = pl.CostEstimate(
        flops=2 * n_pad * n_pad * feat,
        transcendentals=0,
        bytes_accessed=int(g.dtype.itemsize * n_pad * n_pad
                           + xw.dtype.itemsize * n_pad * feat * n_row
                           + 4 * n_pad * feat),
    )
    return pl.pallas_call(
        _propagate_kernel,
        out_shape=jax.ShapeDtypeStruct((n_pad, feat), jnp.float32),
        grid_spec=pltpu.PrefetchScalarGridSpec(
            num_scalar_prefetch=0,
            grid=(n_row, n_pad // tk),
            in_specs=[
                pl.BlockSpec((tm, tk), lambda i, k: (i, k)),
                pl.BlockSpec((tk, feat), lambda i, k: (k, 0)),
            ],
            out_specs=pl.BlockSpec((tm, feat), lambda i, k: (i, 0)),
        ),
        compiler_params=pltpu.CompilerParams(
            dimension_semantics=("parallel", "arbitrary"),
            vmem_limit_bytes=_vmem_limit_bytes(),
        ),
        cost_estimate=cost,
    )(g, xw)


# ---------------------------------------------------------------------------
# Full HGIB_v0 forward (eval mode)
# ---------------------------------------------------------------------------
def hgib_forward(x, g, params, *, heads, mm_dtype=jnp.bfloat16,
                 tm_req=1024, tk_req=4096):
    """Returns (y1, structure_kl_loss) matching HGIB_v0.forward in eval mode.

    mm_dtype: storage dtype of the HBM-bandwidth-bound streams (G and x@W);
    MXU accumulation is always f32.  bf16 by default; on v7x this can be set
    to jnp.float8_e4m3fn after re-validating accuracy at the target N.
    """
    # TODO(synk): fp8 (v7x) propagation path is exposed via mm_dtype but not
    # validated here; keep bf16 unless accuracy at target N has been checked.
    w1, b1, att = params["w1"], params["b1"], params["att"]
    w2, b2 = params["w2"], params["b2"]
    n, in_ch = x.shape
    n_hid = w1.shape[1]
    n_class = w2.shape[1]
    assert g.shape == (n, n)

    tm, tk, n_pad = _plan_tiles(n, heads, tm_req=tm_req, tk_req=tk_req)

    # Lane-dense (multiple-of-128) feature / contraction padding; zero padding
    # keeps the math exact (padded G rows/cols are zero, padded weight cols are
    # zero, so padded rows yield h == 0 -> alpha == 0.5 -> KL contribution 0).
    in_p = _round_up(in_ch, LANE)
    h_p = _round_up(n_hid, LANE)
    c_p = _round_up(n_class, LANE)

    x_p = jnp.zeros((n_pad, in_p), jnp.float32).at[:n, :in_ch].set(x)
    w1_p = jnp.zeros((in_p, h_p), jnp.float32).at[:in_ch, :n_hid].set(w1)
    b1_p = jnp.zeros((1, h_p), jnp.float32).at[0, :n_hid].set(b1)
    w2_p = jnp.zeros((h_p, c_p), jnp.float32).at[:n_hid, :n_class].set(w2)
    b2_p = jnp.zeros((1, c_p), jnp.float32).at[0, :n_class].set(b2)
    att_p = jnp.zeros((heads, h_p), jnp.float32).at[:, :n_hid].set(att)
    # Row r of a tile uses att[r % heads]; only one row tile is materialized.
    att_tile = jnp.tile(att_p, (tm // heads, 1))

    # G is padded + quantized once.  In steady-state training/inference G is
    # fixed, so this preparation should be hoisted out of the per-step forward.
    g_mm = jnp.zeros((n_pad, n_pad), mm_dtype).at[:n, :n].set(g.astype(mm_dtype))

    # --- layer 1: HGNNPConv_GIB_v1 (is_last=False), with the KL epilogue and
    #     the layer-2 theta projection fused in (h never round-trips to HBM).
    xw1 = linear(x_p, w1_p, b1_p, tm=tm, out_dtype=mm_dtype)       # x @ W1 + b1
    xw2, kl_tiles = propagate1_fused(g_mm, xw1, att_tile, w2_p, b2_p,
                                     n_hid, tm=tm, tk=tk, xw2_dtype=mm_dtype)
    # TODO(synk): dropout / BatchNorm are identity here (eval mode, use_bn=False);
    # training-mode dropout masks are not implemented.
    kl1 = jnp.sum(kl_tiles)   # per-row-tile partial sums; padded rows contribute 0

    # --- layer 2: HGNNPConv (is_last=True): y1 = G @ (h @ W2 + b2) ---
    y1_p = propagate(g_mm, xw2, tm=tm, tk=tk)
    return y1_p[:n, :n_class], kl1


# ---------------------------------------------------------------------------
# Plain-JAX reference of the PyTorch math (eval mode)
# ---------------------------------------------------------------------------
def reference_forward(x, g, params, heads, mm_dtype=jnp.float32):
    hi = jax.lax.Precision.HIGHEST
    w1, b1, att = params["w1"], params["b1"], params["att"]
    w2, b2 = params["w2"], params["b2"]
    n_hid = w1.shape[1]
    g_mm = g.astype(mm_dtype)
    xw1 = (jnp.dot(x, w1, precision=hi) + b1[None, :]).astype(mm_dtype)
    h = jnp.maximum(jnp.dot(g_mm, xw1, precision=hi,
                            preferred_element_type=jnp.float32), 0.0)
    x1 = h.reshape(-1, heads, n_hid)
    alpha = jnp.mean(x1 * att[None, :, :], axis=-1).reshape(-1)
    alpha = jnp.where(alpha >= 0.0, alpha, 0.2 * alpha)
    alpha = jnp.clip(jax.nn.sigmoid(alpha), 0.01, 0.99)
    kl = alpha * jnp.log(alpha / 0.5) + (1.0 - alpha) * jnp.log((1.0 - alpha) / 0.5)
    kl1 = jnp.sum(kl)
    xw2 = (jnp.dot(h, w2, precision=hi) + b2[None, :]).astype(mm_dtype)
    y1 = jnp.dot(g_mm, xw2, precision=hi, preferred_element_type=jnp.float32)
    return y1, kl1


if __name__ == "__main__":
    key = jax.random.PRNGKey(0)
    k_x, k_g, k_w1, k_b1, k_att, k_w2, k_b2 = jax.random.split(key, 7)

    # Small HGIB_v0 config: N vertices, in_ch -> n_hid -> n_class, 8 heads.
    N, in_ch, n_hid, n_class, heads = 128, 64, 96, 3, 8

    x = jax.random.normal(k_x, (N, in_ch), jnp.float32)
    # TODO(synk): dhg.Hypergraph.v2v(aggr='mean') is modeled as a dense
    # row-normalized (N,N) propagation matrix G; sparse incidence formats are
    # not implemented.
    g = jax.random.uniform(k_g, (N, N), jnp.float32)
    g = g / jnp.sum(g, axis=1, keepdims=True)

    stdv1 = 1.0 / math.sqrt(n_hid)
    stdv2 = 1.0 / math.sqrt(n_class)
    params = {
        "w1": jax.random.uniform(k_w1, (in_ch, n_hid), jnp.float32, -stdv1, stdv1),
        "b1": jax.random.uniform(k_b1, (n_hid,), jnp.float32, -stdv1, stdv1),
        "att": jax.random.uniform(k_att, (heads, n_hid), jnp.float32, -stdv1, stdv1),
        "w2": jax.random.uniform(k_w2, (n_hid, n_class), jnp.float32, -stdv2, stdv2),
        "b2": jax.random.uniform(k_b2, (n_class,), jnp.float32, -stdv2, stdv2),
    }

    y1, kl1 = hgib_forward(x, g, params, heads=heads)
    y1 = jax.block_until_ready(y1)
    kl1 = jax.block_until_ready(kl1)
    assert y1.shape == (N, n_class)

    # (a) reference with matched bf16 quantization of the bandwidth-bound
    #     streams -> validates the kernels themselves (tight tolerance).
    y_ref_q, kl_ref_q = reference_forward(x, g, params, heads, mm_dtype=jnp.bfloat16)
    assert jnp.allclose(y1, y_ref_q, atol=3e-3, rtol=3e-3), \
        float(jnp.max(jnp.abs(y1 - y_ref_q)))
    assert jnp.allclose(kl1, kl_ref_q, atol=2e-3, rtol=2e-3), \
        (float(kl1), float(kl_ref_q))

    # (b) exact f32 reference -> validates the bf16-G accuracy tradeoff.
    y_ref_f, kl_ref_f = reference_forward(x, g, params, heads, mm_dtype=jnp.float32)
    assert jnp.allclose(y1, y_ref_f, atol=5e-2, rtol=5e-2), \
        float(jnp.max(jnp.abs(y1 - y_ref_f)))
    assert jnp.allclose(kl1, kl_ref_f, atol=5e-2, rtol=5e-2), \
        (float(kl1), float(kl_ref_f))

    print("KERNEL_OK")
</pallas_src>

<mosaic_0001>
module attributes {stable_mosaic.version = 11 : i64} {
  func.func @_linear_kernel(%arg0: i32, %arg1: memref<64x128xf32, #tpu.memory_space<vmem>>, %arg2: memref<128x128xf32, #tpu.memory_space<vmem>>, %arg3: memref<1x128xf32, #tpu.memory_space<vmem>>, %arg4: memref<64x128xbf16, #tpu.memory_space<vmem>>) attributes {dimension_semantics = [#tpu.dimension_semantics<parallel>], iteration_bounds = array<i64: 2>, scalar_prefetch = 0 : i64, scratch_operands = 0 : i64, tpu.core_type = #tpu.core_type<tc>, window_params = [{transform_indices = @transform_0, window_bounds = array<i64: 64, 128>}, {pipeline_mode = #tpu.pipeline_mode<synchronous>, transform_indices = @transform_1, window_bounds = array<i64: 128, 128>}, {pipeline_mode = #tpu.pipeline_mode<synchronous>, transform_indices = @transform_2, window_bounds = array<i64: 1, 128>}, {transform_indices = @transform_3, window_bounds = array<i64: 64, 128>}]} {
    %c0 = arith.constant 0 : index
    %c0_0 = arith.constant 0 : index
    %0 = vector.load %arg1[%c0, %c0_0] : memref<64x128xf32, #tpu.memory_space<vmem>>, vector<64x128xf32>
    %c0_1 = arith.constant 0 : index
    %c0_2 = arith.constant 0 : index
    %1 = vector.load %arg2[%c0_1, %c0_2] : memref<128x128xf32, #tpu.memory_space<vmem>>, vector<128x128xf32>
    %cst = arith.constant dense<0.000000e+00> : vector<64x128xf32>
    %2 = tpu.matmul %0, %1, %cst {dimension_numbers = #tpu.dot_dimension_numbers<[1], [0], [0], [1], [0, 0, 1, 1], [], []>} : vector<64x128xf32>, vector<128x128xf32>, vector<64x128xf32> -> vector<64x128xf32>
    %c0_3 = arith.constant 0 : index
    %c0_4 = arith.constant 0 : index
    %3 = vector.load %arg3[%c0_3, %c0_4] : memref<1x128xf32, #tpu.memory_space<vmem>>, vector<1x128xf32>
    %4 = vector.broadcast %3 : vector<1x128xf32> to vector<64x128xf32>
    %5 = arith.addf %2, %4 : vector<64x128xf32>
    %6 = arith.truncf %5 : vector<64x128xf32> to vector<64x128xbf16>
    %c0_5 = arith.constant 0 : index
    %c0_6 = arith.constant 0 : index
    %7 = vector.load %arg4[%c0_5, %c0_6] : memref<64x128xbf16, #tpu.memory_space<vmem>>, vector<64x128xbf16>
    tpu.vector_store %arg4[%c0_5, %c0_6], %6 {strides = array<i32>} : memref<64x128xbf16, #tpu.memory_space<vmem>>, vector<64x128xbf16>,
    return
  }
  func.func @transform_0(%arg0: i32) -> (i32, i32) {
    %c0_i32 = arith.constant 0 : i32
    %c0_i32_0 = arith.constant 0 : i32
    return %arg0, %c0_i32 : i32, i32
  }
  func.func @transform_1(%arg0: i32) -> (i32, i32) {
    %c0_i32 = arith.constant 0 : i32
    %c0_i32_0 = arith.constant 0 : i32
    %c0_i32_1 = arith.constant 0 : i32
    return %c0_i32, %c0_i32_0 : i32, i32
  }
  func.func @transform_2(%arg0: i32) -> (i32, i32) {
    %c0_i32 = arith.constant 0 : i32
    %c0_i32_0 = arith.constant 0 : i32
    %c0_i32_1 = arith.constant 0 : i32
    return %c0_i32, %c0_i32_0 : i32, i32
  }
  func.func @transform_3(%arg0: i32) -> (i32, i32) {
    %c0_i32 = arith.constant 0 : i32
    %c0_i32_0 = arith.constant 0 : i32
    return %arg0, %c0_i32 : i32, i32
  }
}

</mosaic_0001>

<bundles_post_ra>
// kernel: tpu_custom_call.1
= control target key start
LH: loop header
LB: loop body
LE: loop exit
PB: predicated region body
PF: predicated region fallthrough
CT: control target
= control target key end

     0   :  { %8 = vsyncpa [#allocation3], 0  ;;  %s860_s0 = inlined_call_operand.hbm [shape: f32[128,128], index: 0, kind: input, shape index: {}]   ;;  %s861_s1 = inlined_call_operand.hbm [shape: f32[128,128], index: 1, kind: input, shape index: {}]   ;;  %s862_s2 = inlined_call_operand.vmem [shape: f32[1,128], index: 2, kind: input, shape index: {}]   ;;  %s863_s3 = inlined_call_operand.hbm [shape: bf16[128,128], index: 3, kind: output, shape index: {}]  }
   0x1   :  { %10 = vsyncpa [#allocation3 + $0x1], 0 }
   0x2   :  { %11 = vsyncpa [#allocation6], 0 }
   0x3   :  { %12 = vsyncpa [#allocation4], 0 }
   0x4   :  { %14 = vsyncpa [#allocation4 + $0x1], 0  ;;  %s702_s12 = smov 0   ;;  %s704_s13 = smov 0  }
   0x5   :  { %s706_s14 = smov 0   ;;  %s708_s15 = smov 0  }
   0x6 LB: > { %s723_s16 = sadd.s32 4294967295, %s675_s15   ;;  %s394_s17 = sadd.s32 4294967294, %s675_s15   ;;  %s675_s15 = sphi %s708_s15, %s873_s15   ;;  %s671_s14 = sphi %s706_s14, %s872_s14   ;;  %s667_s13 = sphi %s704_s13, %s871_s13   ;;  %s663_s12 = sphi %s702_s12, %s870_s12  }
   0x7   : > { %p40_p0 = scmp.ne.s32.totalorder %s667_s13, %s663_s12  ;;  %p41_p1 = scmp.eq.s32.totalorder %s723_s16, 0 }
   0x8   : > { %p106_p2 = scmp.eq.s32.totalorder %s723_s16, 1  ;;  %p112_p3 = scmp.eq.s32.totalorder %s394_s17, 1 }
   0x9   : > { %p732_p4 = por %p41_p1, %p40_p0  ;;  %p395_p5 = scmp.ge.s32.totalorder %s675_s15, 1 }
   0xa   : > { %p737_p6 = por %p112_p3, %p40_p0  ;;  %p119_p7 = scmp.lt.s32.totalorder %s675_s15, 3 }
   0xb   : > { %s130_s22 = sshll.u32 %s861_s1, 4  ;;  %s677_s24 = smov [#allocation5]   ;;  %s131_s22 = int_to_ptr.hbm [resolvable:$true] %s130_s22 }
   0xc   : > { %p745_p8 = pnand %p395_p5, %p119_p7  ;;  %s132_s25 = sshll.u32 %s677_s24, 4  ;;  %s133_s25 = int_to_ptr.vmem [resolvable:$true] %s132_s25 }
   0xd   : > { %s755_s26 = sadd.s32 1, %s675_s15   ;;  %s678_s27 = smov 128  }
   0xe   : > { %p491_p9 = pneg %p745_p8  ;;  %s679_s28 = smov 8  }
   0xf   : > { %s24_s29 = ssub.s32 %s675_s15, %s755_s26  ;;  %s27_s30 = sadd.s32 1, %s671_s14 }
  0x10   : > { %p492_p10 = pnand %p491_p9, %p41_p1  ;;  %p25_p12 = scmp.eq.s32.totalorder %s24_s29, 0 }
  0x11   : > { %p34_p13 = scmp.ne.s32.totalorder %s671_s14, %s667_s13  ;;  %p35_p0 = scmp.eq.s32.totalorder %s675_s15, 0 }
  0x12   : > { %494 = dma.hbm_to_vmem [thread:$0]  (!%p492_p10), %s131_s22, 2048, %s133_s25, [#allocation6], %s678_s27, %s678_s27, %s679_s28  }
  0x13   : > { %s767_s4 = scalar_select %p25_p12, %s671_s14, %s27_s30  }
  0x14   : > { %p771_p3 = por %p106_p2, %p34_p13  ;;  %p504_p5 = scmp.lt.s32.totalorder %s675_s15, 2 }
  0x15   : > { %s149_s6 = sand.u32 1, %s671_s14   ;;  %s410_s7 = sshll.u32 %s675_s15, 6 }
  0x16   : > { %p36_p7 = por %p35_p0, %p34_p13  ;;  %s398_s8 = sshll.u32 %s149_s6, 6 }
  0x17   : > { %s158_s11 = scalar_lea.hbm %s860_s0, %s410_s7  ;;  %s153_s20 = scalar_lea.vmem [#allocation2], %s398_s8 }
  0x18   : > { %s159_s17 = sshll.u32 %s158_s11, 4  ;;  %s161_s21 = sshll.u32 %s153_s20, 4  ;;  %s160_s17 = int_to_ptr.hbm [resolvable:$true] %s159_s17  ;;  %s162_s21 = int_to_ptr.vmem [resolvable:$true] %s161_s21 }
  0x19   : > { %p781_p9 = pnand %p504_p5, %p36_p7  ;;  %s150_s24 = scalar_lea.sflag [#allocation3], %s149_s6 }
  0x1a   : > { %s575_s25 = sshra.s32 %s160_s17, 4  ;;  %s582_s8 = scalar_lea.hbm %s860_s0, 128  ;;  %s576_s25 = int_to_ptr.hbm [resolvable:$true] %s575_s25 }
  0x1b   : > { %s577_s29 = scalar_lea.hbm %s576_s25, 64  ;;  %p579_p10 = pneg %p781_p9 }
  0x1c   : > { %p578_p2 = scmp.ne.s32.totalorder %s576_s25, %s577_s29  ;;  %p583_p0 = scmp.lt.s32.totalorder %s576_s25, %s860_s0 }
  0x1d   : > { %p584_p5 = scmp.lt.s32.totalorder %s582_s8, %s577_s29 }
  0x1e   : > { %p580_p12 = pnand %p579_p10, %p578_p2 }
  0x1f   : > { %p585_p7 = por %p584_p5, %p583_p0 }
  0x20   : > { %p581_p13 = pneg %p580_p12 }
  0x22   : > { %p586_p11 = pnand %p585_p7, %p581_p13 }
  0x24   : > { %589 = shalt.err (!%p586_p11)
}
  0x25   : > { %498 = dma.hbm_to_vmem [thread:$0]  (!%p781_p9), %s160_s17, 1024, %s162_s21, %s150_s24, %s678_s27, %s678_s27, %s679_s28  }
  0x26   : > { %173 = sbr.rel (%p745_p8) target bundleno = 229 (0xe5), region = 32  ;;  %s801_s6 = sand.u32 (!%p745_p8), 1, %s667_s13  }
  0x27   : > { %s402_s11 = sshll.u32 (!%p745_p8), %s801_s6, 6  ;;  %s176_s20 = scalar_lea.sflag (!%p745_p8), [#allocation3], %s801_s6 }
  0x28   : > { %s805_s25 = scalar_lea.vmem (!%p745_p8), [#allocation2], %s402_s11 }
  0x2b   : > { %650 = dma.done.wait (%p732_p4), %s176_s20, 1024  }
  0x2c   : > { %652 = vsyncadd (%p732_p4), %s176_s20, 4294966272 }
  0x2d   : > { %654 = dma.done.wait (%p41_p1), [#allocation6], 2048  }
  0x2e   : > { %656 = vsyncadd (%p41_p1), [#allocation6], 4294965248  ;;  %v233_v0 = vld [vmem:[#allocation5 + $0x78] sm:$0xff]  ;;  %v232_v1 = vld [vmem:[#allocation5 + $0x70] sm:$0xff]  ;;  %s404_s27 = sshll.u32 %s801_s6, 5  ;;  %s411_s28 = sshll.u32 %s723_s16, 5 }
  0x2f   : > { %238 = vmatpush.msra.mxu0 %v233_v0  ;;  %435 = vmatpush.msra.mxu1 %v233_v0  ;;  %v231_v2 = vld [vmem:[#allocation5 + $0x68] sm:$0xff]  ;;  %v230_v3 = vld [vmem:[#allocation5 + $0x60] sm:$0xff]  ;;  %v229_v4 = vld [vmem:[#allocation5 + $0x58] sm:$0xff]  ;;  %s307_s22 = scalar_lea.hbm %s863_s3, %s411_s28  ;;  %s207_s24 = scalar_lea.vmem [#allocation7], %s404_s27 }
  0x30   : > { %436 = vmatpush.msra.mxu2 %v233_v0  ;;  %437 = vmatpush.msra.mxu3 %v233_v0  ;;  %v228_v5 = vld [vmem:[#allocation5 + $0x50] sm:$0xff]  ;;  %v227_v6 = vld [vmem:[#allocation5 + $0x48] sm:$0xff]  ;;  %v226_v7 = vld [vmem:[#allocation5 + $0x40] sm:$0xff]  ;;  %s308_s29 = sshll.u32 %s207_s24, 4  ;;  %s310_s30 = sshll.u32 %s307_s22, 4  ;;  %s309_s29 = int_to_ptr.vmem [resolvable:$true] %s308_s29  ;;  %s311_s30 = int_to_ptr.hbm [resolvable:$true] %s310_s30 }
  0x31   : > { %239 = vmatpush.msra.mxu0 %v232_v1  ;;  %438 = vmatpush.msra.mxu1 %v232_v1  ;;  %v225_v8 = vld [vmem:[#allocation5 + $0x38] sm:$0xff]  ;;  %v224_v9 = vld [vmem:[#allocation5 + $0x30] sm:$0xff]  ;;  %v223_v10 = vld [vmem:[#allocation5 + $0x28] sm:$0xff]  ;;  %s296_s16 = scalar_lea.sflag [#allocation4], %s801_s6  ;;  %s619_s7 = sshra.s32 %s311_s30, 4  ;;  %s620_s7 = int_to_ptr.hbm [resolvable:$true] %s619_s7 }
  0x32   : > { %439 = vmatpush.msra.mxu2 %v232_v1  ;;  %440 = vmatpush.msra.mxu3 %v232_v1  ;;  %v222_v11 = vld [vmem:[#allocation5 + $0x20] sm:$0xff]  ;;  %v221_v12 = vld [vmem:[#allocation5 + $0x18] sm:$0xff]  ;;  %v220_v13 = vld [vmem:[#allocation5 + $0x10] sm:$0xff]  ;;  %s621_s8 = scalar_lea.hbm %s620_s7, 32  ;;  %s625_s11 = scalar_lea.hbm %s863_s3, 64 }
  0x33   : > { %240 = vmatpush.msra.mxu0 %v231_v2  ;;  %441 = vmatpush.msra.mxu1 %v231_v2  ;;  %v219_v14 = vld [vmem:[#allocation5 + $0x8] sm:$0xff]  ;;  %v218_v15 = vld [vmem:[#allocation5] sm:$0xff]  ;;  %v212_v17 = vld [vmem:[%s805_s25 + $0x10] sm:$0xff]  ;;  %p622_p1 = scmp.ne.s32.totalorder %s620_s7, %s621_s8  ;;  %p626_p11 = scmp.lt.s32.totalorder %s620_s7, %s863_s3 }
  0x34   : > { %442 = vmatpush.msra.mxu2 %v231_v2  ;;  %443 = vmatpush.msra.mxu3 %v231_v2  ;;  %v210_v16 = vld [vmem:[%s805_s25] sm:$0xff]  ;;  %v216_v19 = vld [vmem:[%s805_s25 + $0x30] sm:$0xff]  ;;  %v211_v20 = vld [vmem:[%s805_s25 + $0x8] sm:$0xff]  ;;  %p627_p9 = scmp.lt.s32.totalorder %s625_s11, %s621_s8 }
  0x35   : > { %241 = vmatpush.msra.mxu0 %v230_v3  ;;  %444 = vmatpush.msra.mxu1 %v230_v3  ;;  %v214_v18 = vld [vmem:[%s805_s25 + $0x20] sm:$0xff]  ;;  %v213_v21 = vld [vmem:[%s805_s25 + $0x18] sm:$0xff]  ;;  %v215_v22 = vld [vmem:[%s805_s25 + $0x28] sm:$0xff]  ;;  %p623_p4 = pnand %p622_p1, %p771_p3 }
  0x36   : > { %445 = vmatpush.msra.mxu2 %v230_v3  ;;  %446 = vmatpush.msra.mxu3 %v230_v3  ;;  %v217_v23 = vld [vmem:[%s805_s25 + $0x38] sm:$0xff]  ;;  %v544_v26 = vld [vmem:[%s862_s2] ss:$0 sm:$0xff]  ;;  %p628_p2 = por %p627_p9, %p626_p11 }
  0x37   : > { %242 = vmatpush.msra.mxu0 %v229_v4  ;;  %447 = vmatpush.msra.mxu1 %v229_v4  ;;  %p624_p8 = pneg %p623_p4 }
  0x38   : > { %448 = vmatpush.msra.mxu2 %v229_v4  ;;  %449 = vmatpush.msra.mxu3 %v229_v4 }
  0x39   : > { %243 = vmatpush.msra.mxu0 %v228_v5  ;;  %450 = vmatpush.msra.mxu1 %v228_v5  ;;  %p629_p10 = pnand %p628_p2, %p624_p8 }
  0x3a   : > { %451 = vmatpush.msra.mxu2 %v228_v5  ;;  %452 = vmatpush.msra.mxu3 %v228_v5 }
  0x3b   : > { %244 = vmatpush.msra.mxu0 %v227_v6  ;;  %453 = vmatpush.msra.mxu1 %v227_v6 }
  0x3c   : > { %454 = vmatpush.msra.mxu2 %v227_v6  ;;  %455 = vmatpush.msra.mxu3 %v227_v6 }
  0x3d   : > { %245 = vmatpush.msra.mxu0 %v226_v7  ;;  %456 = vmatpush.msra.mxu1 %v226_v7 }
  0x3e   : > { %457 = vmatpush.msra.mxu2 %v226_v7  ;;  %458 = vmatpush.msra.mxu3 %v226_v7 }
  0x3f   : > { %246 = vmatpush.msra.mxu0 %v225_v8  ;;  %459 = vmatpush.msra.mxu1 %v225_v8 }
  0x40   : > { %460 = vmatpush.msra.mxu2 %v225_v8  ;;  %461 = vmatpush.msra.mxu3 %v225_v8 }
  0x41   : > { %247 = vmatpush.msra.mxu0 %v224_v9  ;;  %462 = vmatpush.msra.mxu1 %v224_v9 }
  0x42   : > { %463 = vmatpush.msra.mxu2 %v224_v9  ;;  %464 = vmatpush.msra.mxu3 %v224_v9 }
  0x43   : > { %248 = vmatpush.msra.mxu0 %v223_v10  ;;  %465 = vmatpush.msra.mxu1 %v223_v10 }
  0x44   : > { %466 = vmatpush.msra.mxu2 %v223_v10  ;;  %467 = vmatpush.msra.mxu3 %v223_v10 }
  0x45   : > { %249 = vmatpush.msra.mxu0 %v222_v11  ;;  %468 = vmatpush.msra.mxu1 %v222_v11 }
  0x46   : > { %469 = vmatpush.msra.mxu2 %v222_v11  ;;  %470 = vmatpush.msra.mxu3 %v222_v11 }
  0x47   : > { %250 = vmatpush.msra.mxu0 %v221_v12  ;;  %471 = vmatpush.msra.mxu1 %v221_v12 }
  0x48   : > { %472 = vmatpush.msra.mxu2 %v221_v12  ;;  %473 = vmatpush.msra.mxu3 %v221_v12 }
  0x49   : > { %251 = vmatpush.msra.mxu0 %v220_v13  ;;  %474 = vmatpush.msra.mxu1 %v220_v13 }
  0x4a   : > { %475 = vmatpush.msra.mxu2 %v220_v13  ;;  %476 = vmatpush.msra.mxu3 %v220_v13 }
  0x4b   : > { %252 = vmatpush.msra.mxu0 %v219_v14  ;;  %477 = vmatpush.msra.mxu1 %v219_v14 }
  0x4c   : > { %478 = vmatpush.msra.mxu2 %v219_v14  ;;  %479 = vmatpush.msra.mxu3 %v219_v14 }
  0x4d   : > { %253 = vmatpush.msra.mxu0 %v218_v15  ;;  %480 = vmatpush.msra.mxu1 %v218_v15 }
  0x4e   : > { %481 = vmatpush.msra.mxu2 %v218_v15  ;;  %482 = vmatpush.msra.mxu3 %v218_v15 }
  0x4f   : > { %254 = vmatmul.f32.vlgmr.msra.gmra.mxu0 %v210_v16  ;;  %260 = vmatmul.f32.vlgmr.msra.gmra.mxu1 %v212_v17 }
  0x50   : > { %266 = vmatmul.f32.vlgmr.msra.gmra.mxu2 %v214_v18  ;;  %272 = vmatmul.f32.vlgmr.msra.gmra.mxu3 %v216_v19 }
  0x57   : > { %257 = vmatmul.f32.gmra.mxu0 %v211_v20  ;;  %263 = vmatmul.f32.gmra.mxu1 %v213_v21 }
  0x58   : > { %269 = vmatmul.f32.gmra.mxu2 %v215_v22  ;;  %275 = vmatmul.f32.gmra.mxu3 %v217_v23 }
  0xcc   : > { %v255_v24 = vpop.f32.mrf.mxu0  ;;  %v261_v25 = vpop.f32.mrf.mxu1 }
  0xcd   : > { %v256_v31 = vadd.f32 %v544_v26, %v255_v24  ;;  %v262_v32 = vadd.f32 %v544_v26, %v261_v25 }
  0xd3   : > { %v267_v27 = vpop.f32.mrf.mxu2  ;;  %v273_v28 = vpop.f32.mrf.mxu3 }
  0xd4   : > { %v258_v29 = vpop.f32.mrf.mxu0  ;;  %v264_v30 = vpop.f32.mrf.mxu1  ;;  %v268_v39 = vadd.f32 %v544_v26, %v267_v27  ;;  %v274_v40 = vadd.f32 %v544_v26, %v273_v28 }
  0xd5   : > { %v259_v33 = vadd.f32 %v544_v26, %v258_v29  ;;  %v265_v34 = vadd.f32 %v544_v26, %v264_v30 }
  0xd7   : > { %v415_v35 = vpack.c.bf16 %v259_v33, %v256_v31  ;;  %v420_v36 = vpack.c.bf16 %v265_v34, %v262_v32 }
  0xd9   : > { %416 = vst [vmem:[%s207_s24] sm:$0xff] %v415_v35  }
  0xda   : > { %432 = vst [vmem:[%s207_s24 + $0x8] sm:$0xff] %v420_v36  }
  0xdb   : > { %v270_v37 = vpop.f32.mrf.mxu2  ;;  %v276_v38 = vpop.f32.mrf.mxu3 }
  0xdc   : > { %v271_v41 = vadd.f32 %v544_v26, %v270_v37  ;;  %v277_v42 = vadd.f32 %v544_v26, %v276_v38 }
  0xde   : > { %v425_v43 = vpack.c.bf16 %v271_v41, %v268_v39  ;;  %v430_v44 = vpack.c.bf16 %v277_v42, %v274_v40 }
  0xe0   : > { %433 = vst [vmem:[%s207_s24 + $0x10] sm:$0xff] %v425_v43  }
  0xe1   : > { %434 = vst [vmem:[%s207_s24 + $0x18] sm:$0xff] %v430_v44  }
  0xe2   : > { %632 = shalt.err (!%p629_p10)
}
  0xe3   : > { %s680_s6 = smov 64   ;;  %s681_s18 = smov 4  }
  0xe4   : > { %489 = dma.vmem_to_hbm [thread:$0]  (%p771_p3), %s309_s29, 512, %s311_s30, %s296_s16, %s680_s6, %s680_s6, %s681_s18  }
  0xe5 PF: > { %s325_s23 = sand.u32 1, %s663_s12   ;;  %p869_p12 = scmp.ge.s32.totalorder %s675_s15, 2 }
  0xe6   : > { %s326_s27 = scalar_lea.sflag [#allocation4], %s325_s23 }
  0xe7   : > { %p500_p13 = pnand %p869_p12, %p737_p6 }
  0xe9   : > { %p501_p0 = pneg %p500_p13 }
  0xeb   : > { %658 = dma.done.wait (%p501_p0), %s326_s27, 512  }
  0xec   : > { %660 = vsyncadd (%p501_p0), %s326_s27, 4294966784  ;;  %p17_p5 = scmp.ge.s32.totalorder %s755_s26, 4   ;;  %s870_s12 = smov %s667_s13 }
  0xed   : > { %s871_s13 = smov %s671_s14  ;;  %s872_s14 = smov %s767_s4 }
  0xee   : > { %s873_s15 = smov %s755_s26  ;;  %19 = sbr.rel (!%p17_p5) target bundleno = 6 (0x6), region = 81 }
  0xf3   :  { %332 = vsyncpa [#allocation3], 1 }
  0xf4   :  { %334 = vsyncpa [#allocation3 + $0x1], 1 }
  0xf5   :  { %335 = vsyncpa [#allocation6], 1 }
  0xf6   :  { %336 = vsyncpa [#allocation4], 1 }
  0xf7   :  { %338 = vsyncpa [#allocation4 + $0x1], 1 }

</bundles_post_ra>
